<compile_context>
chip_gen: v7x
topology: tpu7x:2x2x1
jax: 0.10.0
libtpu: 0.0.40
codegen_flags: <defaults>
</compile_context>

<pallas_src>
import functools

import jax
import jax.numpy as jnp
from jax.experimental import pallas as pl
from jax.experimental.pallas import tpu as pltpu


def _round_up(x, m):
    return ((x + m - 1) // m) * m


def _linear_masked_kernel(data_ref, w_ref, loss_ref, acc_ref, *,
                          n_rows, tile_rows, tiles_per_split, inv_2n,
                          needs_mask, matmul_dtype):
    c = pl.program_id(0)   # batch split (parallel -> TCs on megacore parts)
    i = pl.program_id(1)   # batch tile within the split (reduction axis)

    @pl.when(i == 0)
    def _init():
        acc_ref[...] = jnp.zeros_like(acc_ref)

    def accumulate(mask_rows):
        data = data_ref[...]
        data_f32 = data.astype(jnp.float32)
        # w_ref is already masked (adj*weights), block-diagonal and cast in
        # the wrapper, so the per-step body is just MXU + VPU residual work.
        out = jnp.dot(data.astype(matmul_dtype), w_ref[...],
                      preferred_element_type=jnp.float32)
        resid = data_f32 - out
        if mask_rows:
            row0 = (c * tiles_per_split + i) * tile_rows
            row_ids = row0 + jax.lax.broadcasted_iota(jnp.int32, resid.shape, 0)
            resid = jnp.where(row_ids < n_rows, resid, 0.0)
        sq = resid * resid
        # Fold the tile to the small (8, D) accumulator: sublane-aligned vreg
        # adds only (no XLU, no full-tile accumulator writeback).
        partial = jnp.sum(sq.reshape(tile_rows // 8, 8, sq.shape[-1]), axis=0)
        acc_ref[...] += partial

    if not needs_mask:
        accumulate(False)
    else:
        tile_idx = c * tiles_per_split + i
        row_start = tile_idx * tile_rows
        row_end = row_start + tile_rows

        @pl.when(row_end <= n_rows)                 # full interior tile
        def _full():
            accumulate(False)

        @pl.when(jnp.logical_and(row_start < n_rows, row_end > n_rows))
        def _edge():                                # the single ragged tile
            accumulate(True)
        # Phantom tiles (row_start >= n_rows): no compute at all.

    @pl.when(i == tiles_per_split - 1)
    def _finalize():
        total = jnp.sum(acc_ref[...], keepdims=True) * inv_2n      # (1, 1)
        loss_ref[...] = jnp.broadcast_to(total, loss_ref.shape)


def linear_masked_loss(data, adj, weights, *, tile_rows=None, num_splits=2,
                       matmul_dtype=jnp.float32,
                       vmem_limit_bytes=48 * 1024 * 1024):
    """Pallas implementation of LinearMasked.forward. Returns a scalar loss.

    `tile_rows`, if given, counts *packed* rows (each packed row holds `pack`
    original data rows after lane packing).
    """
    n, d = data.shape
    assert adj.shape == (d, d) and weights.shape == (d, d)
    assert n > 0

    # Hoisted mask multiply + lane packing via a block-diagonal weight.
    masked_w = (adj * weights).astype(jnp.float32)
    pack = max(1, 128 // d) if d < 128 else 1
    D = pack * d
    if pack > 1:
        w_big = jnp.kron(jnp.eye(pack, dtype=jnp.float32), masked_w)
    else:
        w_big = masked_w
    w_big = w_big.astype(matmul_dtype)

    # Pack `pack` data rows per lane row.  For n % pack == 0 this reshape is
    # a free contiguous relabel; otherwise pad with zero rows (zero rows
    # contribute exactly zero residual, so no extra masking is required).
    n_pad = _round_up(n, pack)
    if n_pad != n:
        data = jnp.pad(data, ((0, n_pad - n), (0, 0)))
    n_rows = n_pad // pack                       # packed row count
    data_p = data.reshape(n_rows, D)

    itemsize = jnp.dtype(data_p.dtype).itemsize
    sublane = max(8, 32 // itemsize)             # 8 f32 / 16 bf16 / 32 int8
    if tile_rows is None:
        # ~2 MiB per data tile: amortises the ~0.35 us grid-step overhead,
        # while double-buffered tiles + temporaries stay far below v7x's
        # 64 MiB per-TC VMEM (v5e/v6e have 128 MiB headroom for deeper
        # pipelining if ever needed).
        target_bytes = 2 * 1024 * 1024
        tile_rows = max(sublane, target_bytes // max(1, D * itemsize))
    tile_rows = max(sublane, (int(tile_rows) // sublane) * sublane)
    tile_rows = min(tile_rows, _round_up(n_rows, sublane))

    total_tiles = pl.cdiv(n_rows, tile_rows)
    num_splits = int(max(1, min(num_splits, total_tiles)))
    tiles_per_split = pl.cdiv(total_tiles, num_splits)
    needs_mask = (num_splits * tiles_per_split * tile_rows) != n_rows
    last_tile = total_tiles - 1

    def data_index_map(c, i):
        t = c * tiles_per_split + i
        # Clamp phantom tiles onto the last real tile; the pipeliner sees an
        # unchanged block index and skips the redundant DMA.
        return (jnp.minimum(t, last_tile), 0)

    kernel = functools.partial(
        _linear_masked_kernel,
        n_rows=n_rows, tile_rows=tile_rows, tiles_per_split=tiles_per_split,
        inv_2n=0.5 / float(n), needs_mask=needs_mask,
        matmul_dtype=matmul_dtype)

    partials = pl.pallas_call(
        kernel,
        out_shape=jax.ShapeDtypeStruct((num_splits, 8, 128), jnp.float32),
        grid_spec=pltpu.PrefetchScalarGridSpec(
            num_scalar_prefetch=0,
            grid=(num_splits, tiles_per_split),
            in_specs=[
                pl.BlockSpec((tile_rows, D), data_index_map),
                pl.BlockSpec((D, D), lambda c, i: (0, 0)),   # VMEM resident
            ],
            out_specs=pl.BlockSpec((1, 8, 128), lambda c, i: (c, 0, 0)),
            scratch_shapes=[pltpu.VMEM((8, D), jnp.float32)],
        ),
        compiler_params=pltpu.CompilerParams(
            dimension_semantics=("parallel", "arbitrary"),
            vmem_limit_bytes=vmem_limit_bytes,
        ),
    )(data_p, w_big)

    # One partial loss per split (separate TCs on megacore parts).
    return jnp.sum(partials[:, 0, 0])


def _reference(data, adj, weights):
    out = data @ (adj * weights)
    return 0.5 * jnp.sum((data - out) ** 2) / data.shape[0]


if __name__ == "__main__":
    key = jax.random.PRNGKey(0)
    k_data, k_w, k2, k3, k4 = jax.random.split(key, 5)

    d = 16
    adj = jnp.triu(jnp.ones((d, d), dtype=jnp.float32), k=1)        # DAG mask
    weights = 0.1 * jax.random.normal(k_w, (d, d), dtype=jnp.float32)

    # Case 1: shapes matching the module's toy usage (32 samples, 16 vars).
    n = 32
    data = jax.random.normal(k_data, (n, d), dtype=jnp.float32)
    loss = jax.block_until_ready(linear_masked_loss(data, adj, weights))
    ref = jax.block_until_ready(_reference(data, adj, weights))
    assert jnp.allclose(loss, ref, rtol=1e-5, atol=1e-5), (loss, ref)

    # Case 2: ragged packed-row count + forced small tile + 2-way split:
    # exercises the unmasked full tile and the masked edge tile.
    n2 = 88
    data2 = jax.random.normal(k2, (n2, d), dtype=jnp.float32)
    loss2 = jax.block_until_ready(
        linear_masked_loss(data2, adj, weights, tile_rows=8, num_splits=2))
    ref2 = jax.block_until_ready(_reference(data2, adj, weights))
    assert jnp.allclose(loss2, ref2, rtol=1e-5, atol=1e-5), (loss2, ref2)

    # Case 3: multi-tile accumulation + phantom tile on the second split
    # (total_tiles=3, tiles_per_split=2) exercising the index-map clamp and
    # the compute skip.
    n3 = 136
    data3 = jax.random.normal(k3, (n3, d), dtype=jnp.float32)
    loss3 = jax.block_until_ready(
        linear_masked_loss(data3, adj, weights, tile_rows=8, num_splits=2))
    ref3 = jax.block_until_ready(_reference(data3, adj, weights))
    assert jnp.allclose(loss3, ref3, rtol=1e-5, atol=1e-5), (loss3, ref3)

    # Case 4: n not a multiple of the pack factor -> zero-pad path.
    n4 = 83
    data4 = jax.random.normal(k4, (n4, d), dtype=jnp.float32)
    loss4 = jax.block_until_ready(linear_masked_loss(data4, adj, weights))
    ref4 = jax.block_until_ready(_reference(data4, adj, weights))
    assert jnp.allclose(loss4, ref4, rtol=1e-5, atol=1e-5), (loss4, ref4)

    # Case 5: bf16 MXU operands (valid on v5e/v6e/v7x), looser tolerance.
    loss5 = jax.block_until_ready(
        linear_masked_loss(data, adj, weights, matmul_dtype=jnp.bfloat16))
    assert jnp.allclose(loss5, ref, rtol=5e-2, atol=5e-2), (loss5, ref)

    print("KERNEL_OK")
</pallas_src>

<mosaic_0001>
module attributes {stable_mosaic.version = 11 : i64} {
  func.func @_linear_masked_kernel(%arg0: i32, %arg1: i32, %arg2: memref<8x128xf32, #tpu.memory_space<vmem>>, %arg3: memref<128x128xf32, #tpu.memory_space<vmem>>, %arg4: memref<1x8x128xf32, #tpu.memory_space<vmem>>, %arg5: memref<8x128xf32, #tpu.memory_space<vmem>>) attributes {dimension_semantics = [#tpu.dimension_semantics<parallel>, #tpu.dimension_semantics<arbitrary>], iteration_bounds = array<i64: 1, 1>, scalar_prefetch = 0 : i64, scratch_operands = 1 : i64, tpu.core_type = #tpu.core_type<tc>, window_params = [{transform_indices = @transform_0, window_bounds = array<i64: 8, 128>}, {pipeline_mode = #tpu.pipeline_mode<synchronous>, transform_indices = @transform_1, window_bounds = array<i64: 128, 128>}, {transform_indices = @transform_2, window_bounds = array<i64: 1, 8, 128>}]} {
    %c0_i32 = arith.constant 0 : i32
    %0 = arith.cmpi eq, %arg1, %c0_i32 : i32
    %1 = arith.extui %0 : i1 to i32
    %c0_i32_0 = arith.constant 0 : i32
    %2 = arith.cmpi ne, %1, %c0_i32_0 : i32
    scf.if %2 {
      %cst = arith.constant 0.000000e+00 : f32
      %18 = vector.broadcast %cst : f32 to vector<8x128xf32>
      %c0 = arith.constant 0 : index
      %c0_8 = arith.constant 0 : index
      %19 = vector.load %arg5[%c0, %c0_8] : memref<8x128xf32, #tpu.memory_space<vmem>>, vector<8x128xf32>
      tpu.vector_store %arg5[%c0, %c0_8], %18 {strides = array<i32>} : memref<8x128xf32, #tpu.memory_space<vmem>>, vector<8x128xf32>,
    } else {
    }
    %c1_i32 = arith.constant 1 : i32
    %3 = arith.muli %arg0, %c1_i32 : i32
    %4 = arith.addi %3, %arg1 : i32
    %c8_i32 = arith.constant 8 : i32
    %5 = arith.muli %4, %c8_i32 : i32
    %c8_i32_1 = arith.constant 8 : i32
    %6 = arith.addi %5, %c8_i32_1 : i32
    %c4_i32 = arith.constant 4 : i32
    %7 = arith.cmpi sle, %6, %c4_i32 : i32
    %8 = arith.extui %7 : i1 to i32
    %c0_i32_2 = arith.constant 0 : i32
    %9 = arith.cmpi ne, %8, %c0_i32_2 : i32
    scf.if %9 {
      %c0 = arith.constant 0 : index
      %c0_8 = arith.constant 0 : index
      %18 = vector.load %arg2[%c0, %c0_8] : memref<8x128xf32, #tpu.memory_space<vmem>>, vector<8x128xf32>
      %c0_9 = arith.constant 0 : index
      %c0_10 = arith.constant 0 : index
      %19 = vector.load %arg3[%c0_9, %c0_10] : memref<128x128xf32, #tpu.memory_space<vmem>>, vector<128x128xf32>
      %cst = arith.constant dense<0.000000e+00> : vector<8x128xf32>
      %20 = tpu.matmul %18, %19, %cst {dimension_numbers = #tpu.dot_dimension_numbers<[1], [0], [0], [1], [0, 0, 1, 1], [], []>} : vector<8x128xf32>, vector<128x128xf32>, vector<8x128xf32> -> vector<8x128xf32>
      %21 = arith.subf %18, %20 : vector<8x128xf32>
      %22 = arith.mulf %21, %21 : vector<8x128xf32>
      %23 = vector.shape_cast %22 : vector<8x128xf32> to vector<1x8x128xf32>
      %cst_11 = arith.constant dense<0.000000e+00> : vector<8x128xf32>
      %24 = vector.multi_reduction <add>, %23, %cst_11 [0] : vector<1x8x128xf32> to vector<8x128xf32>
      %c0_12 = arith.constant 0 : index
      %c0_13 = arith.constant 0 : index
      %25 = vector.load %arg5[%c0_12, %c0_13] : memref<8x128xf32, #tpu.memory_space<vmem>>, vector<8x128xf32>
      %26 = arith.addf %25, %24 : vector<8x128xf32>
      %c0_14 = arith.constant 0 : index
      %c0_15 = arith.constant 0 : index
      %27 = vector.load %arg5[%c0_14, %c0_15] : memref<8x128xf32, #tpu.memory_space<vmem>>, vector<8x128xf32>
      tpu.vector_store %arg5[%c0_14, %c0_15], %26 {strides = array<i32>} : memref<8x128xf32, #tpu.memory_space<vmem>>, vector<8x128xf32>,
    } else {
    }
    %c4_i32_3 = arith.constant 4 : i32
    %10 = arith.cmpi slt, %5, %c4_i32_3 : i32
    %c4_i32_4 = arith.constant 4 : i32
    %11 = arith.cmpi sgt, %6, %c4_i32_4 : i32
    %12 = arith.andi %10, %11 : i1
    %13 = arith.extui %12 : i1 to i32
    %c0_i32_5 = arith.constant 0 : i32
    %14 = arith.cmpi ne, %13, %c0_i32_5 : i32
    scf.if %14 {
      %c0 = arith.constant 0 : index
      %c0_8 = arith.constant 0 : index
      %18 = vector.load %arg2[%c0, %c0_8] : memref<8x128xf32, #tpu.memory_space<vmem>>, vector<8x128xf32>
      %c0_9 = arith.constant 0 : index
      %c0_10 = arith.constant 0 : index
      %19 = vector.load %arg3[%c0_9, %c0_10] : memref<128x128xf32, #tpu.memory_space<vmem>>, vector<128x128xf32>
      %cst = arith.constant dense<0.000000e+00> : vector<8x128xf32>
      %20 = tpu.matmul %18, %19, %cst {dimension_numbers = #tpu.dot_dimension_numbers<[1], [0], [0], [1], [0, 0, 1, 1], [], []>} : vector<8x128xf32>, vector<128x128xf32>, vector<8x128xf32> -> vector<8x128xf32>
      %21 = arith.subf %18, %20 : vector<8x128xf32>
      %c1_i32_11 = arith.constant 1 : i32
      %22 = arith.muli %arg0, %c1_i32_11 : i32
      %23 = arith.addi %22, %arg1 : i32
      %c8_i32_12 = arith.constant 8 : i32
      %24 = arith.muli %23, %c8_i32_12 : i32
      %25 = tpu.iota {dimensions = array<i32: 0>} : vector<8x128xi32>
      %26 = vector.broadcast %24 : i32 to vector<8x128xi32>
      %27 = arith.addi %26, %25 : vector<8x128xi32>
      %c4_i32_13 = arith.constant 4 : i32
      %28 = vector.broadcast %c4_i32_13 : i32 to vector<8x128xi32>
      %29 = arith.cmpi slt, %27, %28 : vector<8x128xi32>
      %cst_14 = arith.constant 0.000000e+00 : f32
      %30 = vector.broadcast %cst_14 : f32 to vector<8x128xf32>
      %31 = arith.select %29, %21, %30 : vector<8x128xi1>, vector<8x128xf32>
      %32 = arith.mulf %31, %31 : vector<8x128xf32>
      %33 = vector.shape_cast %32 : vector<8x128xf32> to vector<1x8x128xf32>
      %cst_15 = arith.constant dense<0.000000e+00> : vector<8x128xf32>
      %34 = vector.multi_reduction <add>, %33, %cst_15 [0] : vector<1x8x128xf32> to vector<8x128xf32>
      %c0_16 = arith.constant 0 : index
      %c0_17 = arith.constant 0 : index
      %35 = vector.load %arg5[%c0_16, %c0_17] : memref<8x128xf32, #tpu.memory_space<vmem>>, vector<8x128xf32>
      %36 = arith.addf %35, %34 : vector<8x128xf32>
      %c0_18 = arith.constant 0 : index
      %c0_19 = arith.constant 0 : index
      %37 = vector.load %arg5[%c0_18, %c0_19] : memref<8x128xf32, #tpu.memory_space<vmem>>, vector<8x128xf32>
      tpu.vector_store %arg5[%c0_18, %c0_19], %36 {strides = array<i32>} : memref<8x128xf32, #tpu.memory_space<vmem>>, vector<8x128xf32>,
    } else {
    }
    %c0_i32_6 = arith.constant 0 : i32
    %15 = arith.cmpi eq, %arg1, %c0_i32_6 : i32
    %16 = arith.extui %15 : i1 to i32
    %c0_i32_7 = arith.constant 0 : i32
    %17 = arith.cmpi ne, %16, %c0_i32_7 : i32
    scf.if %17 {
      %c0 = arith.constant 0 : index
      %c0_8 = arith.constant 0 : index
      %18 = vector.load %arg5[%c0, %c0_8] : memref<8x128xf32, #tpu.memory_space<vmem>>, vector<8x128xf32>
      %19 = vector.shape_cast %18 : vector<8x128xf32> to vector<1x8x128xf32>
      %cst = arith.constant dense<0.000000e+00> : vector<1xf32>
      %20 = vector.multi_reduction <add>, %19, %cst [1, 2] : vector<1x8x128xf32> to vector<1xf32>
      %21 = vector.shape_cast %20 : vector<1xf32> to vector<1x1x1xf32>
      %22 = vector.extract %21[0, 0, 0] : f32 from vector<1x1x1xf32>
      %23 = vector.broadcast %22 : f32 to vector<1x1xf32>
      %cst_9 = arith.constant 1.562500e-02 : f32
      %24 = vector.broadcast %cst_9 : f32 to vector<1x1xf32>
      %25 = arith.mulf %23, %24 : vector<1x1xf32>
      %26 = vector.shape_cast %25 : vector<1x1xf32> to vector<1x1x1xf32>
      %27 = vector.broadcast %26 : vector<1x1x1xf32> to vector<1x8x128xf32>
      %c0_10 = arith.constant 0 : index
      %c0_11 = arith.constant 0 : index
      %c0_12 = arith.constant 0 : index
      %28 = vector.load %arg4[%c0_10, %c0_11, %c0_12] : memref<1x8x128xf32, #tpu.memory_space<vmem>>, vector<1x8x128xf32>
      tpu.vector_store %arg4[%c0_10, %c0_11, %c0_12], %27 {strides = array<i32>} : memref<1x8x128xf32, #tpu.memory_space<vmem>>, vector<1x8x128xf32>,
    } else {
    }
    return
  }
  func.func @transform_0(%arg0: i32, %arg1: i32) -> (i32, i32) {
    %c1_i32 = arith.constant 1 : i32
    %0 = arith.muli %arg0, %c1_i32 : i32
    %1 = arith.addi %0, %arg1 : i32
    %c0_i32 = arith.constant 0 : i32
    %2 = arith.minsi %1, %c0_i32 : i32
    %c0_i32_0 = arith.constant 0 : i32
    %c0_i32_1 = arith.constant 0 : i32
    return %2, %c0_i32_0 : i32, i32
  }
  func.func @transform_1(%arg0: i32, %arg1: i32) -> (i32, i32) {
    %c0_i32 = arith.constant 0 : i32
    %c0_i32_0 = arith.constant 0 : i32
    %c0_i32_1 = arith.constant 0 : i32
    return %c0_i32, %c0_i32_0 : i32, i32
  }
  func.func @transform_2(%arg0: i32, %arg1: i32) -> (i32, i32, i32) {
    %c0_i32 = arith.constant 0 : i32
    %c0_i32_0 = arith.constant 0 : i32
    %c0_i32_1 = arith.constant 0 : i32
    return %arg0, %c0_i32, %c0_i32_0 : i32, i32, i32
  }
}

</mosaic_0001>

<bundles_post_ra>
// kernel: tpu_custom_call.1
= control target key start
LH: loop header
LB: loop body
LE: loop exit
PB: predicated region body
PF: predicated region fallthrough
CT: control target
= control target key end

     0   :  { %7 = vsyncpa [#allocation4], 0  ;;  %s521_s0 = inlined_call_operand.hbm [shape: f32[4,128], index: 0, kind: input, shape index: {}]   ;;  %s522_s1 = inlined_call_operand.hbm [shape: f32[128,128], index: 1, kind: input, shape index: {}]   ;;  %s523_s2 = inlined_call_operand.hbm [shape: f32[1,8,128], index: 2, kind: output, shape index: {}]  }
   0x1   :  { %8 = vsyncpa [#allocation7], 0 }
   0x2   :  { %9 = vsyncpa [#allocation5], 0 }
   0x3   :  { %20 = vsyncadd [#allocation4], 64  ;;  %s460_s9 = smov [#allocation3]   ;;  %s388_s13 = scalar_lea.hbm %s521_s0, 64 }
   0x4   :  { %s25_s10 = sshll.u32 %s460_s9, 4  ;;  %p389_p0 = scmp.ne.s32.totalorder %s521_s0, %s388_s13  ;;  %s26_s10 = int_to_ptr.vmem [resolvable:$true] %s25_s10 }
   0x5   :  { %p392_p1 = scmp.lt.u32.totalorder %s388_s13, %s521_s0 }
   0x7   :  { %p394_p2 = pnand %p392_p1, %p389_p0 }
   0x9   :  { %397 = shalt.err (!%p394_p2)
}
   0xa   :  { %s398_s18 = scalar_lea.vmem %s26_s10, 64  ;;  %s402_s19 = scalar_lea.vmem %s26_s10, 128 }
   0xb   :  { %p399_p3 = scmp.ne.s32.totalorder %s26_s10, %s398_s18  ;;  %p403_p4 = scmp.lt.s32.totalorder %s26_s10, %s26_s10 }
   0xc   :  { %p404_p5 = scmp.lt.s32.totalorder %s402_s19, %s398_s18 }
   0xe   :  { %p405_p6 = por %p404_p5, %p403_p4 }
  0x10   :  { %p406_p7 = pnand %p405_p6, %p399_p3 }
  0x12   :  { %409 = shalt.err (!%p406_p7)
}
  0x13   :  { %s461_s20 = smov 64   ;;  %s462_s21 = smov 4  }
  0x14   :  { %31 = dma.hbm_to_vmem [thread:$0]  %s521_s0, 64, %s26_s10, [#allocation4], %s461_s20, %s461_s20, %s462_s21  }
  0x15   :  { %s463_s24 = smov [#allocation6]   ;;  %s410_s28 = scalar_lea.hbm %s522_s1, 2048 }
  0x16   :  { %s37_s25 = sshll.u32 %s463_s24, 4  ;;  %p411_p8 = scmp.ne.s32.totalorder %s522_s1, %s410_s28  ;;  %s38_s25 = int_to_ptr.vmem [resolvable:$true] %s37_s25 }
  0x17   :  { %p414_p9 = scmp.lt.u32.totalorder %s410_s28, %s522_s1 }
  0x19   :  { %p416_p10 = pnand %p414_p9, %p411_p8 }
  0x1b   :  { %419 = shalt.err (!%p416_p10)
}
  0x1c   :  { %s420_s5 = scalar_lea.vmem %s38_s25, 2048  ;;  %p425_p12 = scmp.lt.s32.totalorder %s38_s25, %s38_s25 }
  0x1d   :  { %p421_p11 = scmp.ne.s32.totalorder %s38_s25, %s420_s5  ;;  %p426_p13 = scmp.lt.s32.totalorder %s420_s5, %s420_s5 }
  0x1f   :  { %p427_p0 = por %p426_p13, %p425_p12 }
  0x21   :  { %p428_p1 = pnand %p427_p0, %p421_p11 }
  0x23   :  { %431 = shalt.err (!%p428_p1)
}
  0x24   :  { %s464_s0 = smov 128   ;;  %s465_s6 = smov 8  }
  0x25   :  { %43 = dma.hbm_to_vmem [thread:$0]  %s522_s1, 2048, %s38_s25, [#allocation7], %s464_s0, %s464_s0, %s465_s6  }
  0x26   :  { %454 = dma.done.wait [#allocation4], 128  }
  0x27   :  { %455 = vsyncadd [#allocation4], 4294967168 }
  0x28   :  { %456 = dma.done.wait [#allocation7], 2048  }
  0x29   :  { %457 = vsyncadd [#allocation7], 4294965248  ;;  %v466_v0 = vmov 0.0|0.0   ;;  %vm467_vm0 = vmmov 0   ;;  %v468_v1 = vmov 0.0   ;;  %v168_v2 = vld [vmem:[#allocation6] sm:$0xff]  ;;  %v255_v27 = vlaneseq }
  0x2a   :  { %352 = vmatprep.subr.bf16.mxu0 %v466_v0  ;;  %349 = vmatprep.mubr.msk.f32.mxu0 %vm467_vm0, %v468_v1  ;;  %v169_v3 = vld [vmem:[#allocation6 + $0x8] sm:$0xff]  ;;  %v170_v4 = vld [vmem:[#allocation6 + $0x10] sm:$0xff]  ;;  %v171_v6 = vld [vmem:[#allocation6 + $0x18] sm:$0xff]  ;;  %s469_s1 = smov [#allocation8]  }
  0x2b   :  { %v353_v5 = vpack.c.bf16 %v169_v3, %v168_v2  ;;  %v356_v7 = vpack.c.bf16 %v171_v6, %v170_v4  ;;  %v172_v8 = vld [vmem:[#allocation6 + $0x20] sm:$0xff]  ;;  %v173_v9 = vld [vmem:[#allocation6 + $0x28] sm:$0xff]  ;;  %v174_v11 = vld [vmem:[#allocation6 + $0x30] sm:$0xff]  ;;  %v256_v28 = vshrl.u32 %v255_v27, 7  ;;  %s288_s9 = sshll.u32 %s469_s1, 4  ;;  %s289_s9 = int_to_ptr.vmem [resolvable:$true] %s288_s9 }
  0x2c   :  { %v359_v10 = vpack.c.bf16 %v173_v9, %v172_v8  ;;  %v175_v12 = vld [vmem:[#allocation6 + $0x38] sm:$0xff]  ;;  %v176_v14 = vld [vmem:[#allocation6 + $0x40] sm:$0xff]  ;;  %v177_v15 = vld [vmem:[#allocation6 + $0x48] sm:$0xff]  ;;  %s432_s11 = scalar_lea.vmem %s289_s9, 128  ;;  %p437_p3 = scmp.lt.s32.totalorder %s289_s9, %s289_s9 }
  0x2d   :  { %354 = vmatpush3.bf16.msra.mxu0 %v353_v5  ;;  %v362_v13 = vpack.c.bf16 %v175_v12, %v174_v11  ;;  %v365_v16 = vpack.c.bf16 %v177_v15, %v176_v14  ;;  %v178_v17 = vld [vmem:[#allocation6 + $0x50] sm:$0xff]  ;;  %v179_v18 = vld [vmem:[#allocation6 + $0x58] sm:$0xff]  ;;  %v180_v20 = vld [vmem:[#allocation6 + $0x60] sm:$0xff]  ;;  %vm259_vm1 = vcmp.lt.s32.totalorder %v256_v28, 4  ;;  %p433_p2 = scmp.ne.s32.totalorder %s289_s9, %s432_s11  ;;  %p438_p4 = scmp.lt.s32.totalorder %s432_s11, %s432_s11 }
  0x2e   :  { %355 = vmatprep.subr.bf16.mxu0 %v466_v0  ;;  %v368_v19 = vpack.c.bf16 %v179_v18, %v178_v17  ;;  %v181_v21 = vld [vmem:[#allocation6 + $0x68] sm:$0xff]  ;;  %v182_v23 = vld [vmem:[#allocation6 + $0x70] sm:$0xff]  ;;  %v183_v24 = vld [vmem:[#allocation6 + $0x78] sm:$0xff] }
  0x2f   :  { %v371_v22 = vpack.c.bf16 %v181_v21, %v180_v20  ;;  %v374_v25 = vpack.c.bf16 %v183_v24, %v182_v23  ;;  %v167_v26 = vld [vmem:[#allocation3] sm:$0xff]  ;;  %p439_p5 = por %p438_p4, %p437_p3 }
  0x31   :  { %357 = vmatpush3.bf16.msra.mxu0 %v356_v7  ;;  %p440_p6 = pnand %p439_p5, %p433_p2 }
  0x32   :  { %358 = vmatprep.subr.bf16.mxu0 %v466_v0 }
  0x35   :  { %360 = vmatpush3.bf16.msra.mxu0 %v359_v10 }
  0x36   :  { %361 = vmatprep.subr.bf16.mxu0 %v466_v0 }
  0x39   :  { %363 = vmatpush3.bf16.msra.mxu0 %v362_v13 }
  0x3a   :  { %364 = vmatprep.subr.bf16.mxu0 %v466_v0 }
  0x3d   :  { %366 = vmatpush3.bf16.msra.mxu0 %v365_v16 }
  0x3e   :  { %367 = vmatprep.subr.bf16.mxu0 %v466_v0 }
  0x41   :  { %369 = vmatpush3.bf16.msra.mxu0 %v368_v19 }
  0x42   :  { %370 = vmatprep.subr.bf16.mxu0 %v466_v0 }
  0x45   :  { %372 = vmatpush3.bf16.msra.mxu0 %v371_v22 }
  0x46   :  { %373 = vmatprep.subr.bf16.mxu0 %v466_v0 }
  0x49   :  { %375 = vmatpush3.bf16.msra.mxu0 %v374_v25 }
  0x4c   :  { %350 = vmatmul.mubr.f32.vlgmr.msra.gmra.mrb[0].mxu0 %v167_v26 }
 0x11f   :  { %v250_v29 = vpop.f32.mrb[0].mxu0 }
 0x120   :  { %v254_v30 = vsub.f32 %v167_v26, %v250_v29  ;;  %v351_v31 = vpop.f32.mrb[1].mxu0 }
 0x122   :  { %v260_v32 = vsel %vm259_vm1, %v254_v30, 0.0 }
 0x123   :  { %v261_v33 = vmul.f32 %v260_v32, %v260_v32 }
 0x125   :  { %270 = vadd.xlane.f32.xlu0 %v261_v33 }
 0x1b2   :  { %v271_v34 = vpop.xlane.xlu0 %270 }
 0x1b3   :  { %v272_v35 = vrot.slane %v271_v34, 4 }
 0x1b5   :  { %v273_v36 = vadd.f32 %v272_v35, %v271_v34 }
 0x1b7   :  { %v274_v37 = vrot.slane %v273_v36, 2 }
 0x1b9   :  { %v275_v38 = vadd.f32 %v274_v37, %v273_v36 }
 0x1bb   :  { %v276_v39 = vrot.slane %v275_v38, 1 }
 0x1bd   :  { %v277_v40 = vadd.f32 %v276_v39, %v275_v38 }
 0x1bf   :  { %376 = vpush %v277_v40 }
 0x1f0   :  { %s377_s10 = spop %376 }
 0x1f1   :  { %v279_v41 = vstv %s377_s10 }
 0x1f2   :  { %v280_v42 = vmul.f32 0.015625, %v279_v41 }
 0x1f4   :  { %281 = vst [vmem:[#allocation8] sm:$0xff] %v280_v42 }
 0x1f5   :  { %443 = shalt.err (!%p440_p6)
}
 0x1f6   :  { %s444_s14 = scalar_lea.hbm %s523_s2, 128 }
 0x1f7   :  { %p445_p7 = scmp.ne.s32.totalorder %s523_s2, %s444_s14  ;;  %p448_p8 = scmp.lt.u32.totalorder %s444_s14, %s523_s2 }
 0x1f9   :  { %p450_p9 = pnand %p448_p8, %p445_p7 }
 0x1fb   :  { %453 = shalt.err (!%p450_p9)
}
 0x1fc   :  { %291 = dma.vmem_to_hbm [thread:$0]  %s289_s9, 128, %s523_s2, [#allocation5]  }
 0x1fd   :  { %458 = dma.done.wait [#allocation5], 128  }
 0x1fe   :  { %459 = vsyncadd [#allocation5], 4294967168 }
 0x1ff   :  { %295 = vsyncpa [#allocation4], 1 }
 0x200   :  { %296 = vsyncpa [#allocation7], 1 }
 0x201   :  { %297 = vsyncpa [#allocation5], 1 }

</bundles_post_ra>
